<compile_context>
chip_gen: v7x
topology: tpu7x:2x2x1
jax: 0.10.0
libtpu: 0.0.40
codegen_flags: <defaults>
</compile_context>

<pallas_src>
import functools

import jax
import jax.numpy as jnp
from jax.experimental import pallas as pl
from jax.experimental.pallas import tpu as pltpu

HIDDEN = 256
LANE = 128
MAX_TB = 1024  # largest batch tile (rows); ~1-2 MiB per buffer, tiny vs VMEM


def _round_up(x, m):
    return ((x + m - 1) // m) * m


def _cdiv(a, b):
    return (a + b - 1) // b


def _head_layout(output_dim):
    """Return (out_w, std_start) for the fused [mu | log_std] head slab."""
    if 2 * output_dim <= LANE:
        return LANE, output_dim            # packed single 128-lane block
    out_p = _round_up(output_dim, LANE)
    return 2 * out_p, out_p                # two lane-aligned halves


def policy_net_kernel(x_ref, w1_ref, b1_ref, w2_ref, b2_ref,
                      wh_ref, bh_ref, out_ref, *, std_start):
    # layer1 + ReLU (accumulate f32 on the MXU)
    h1 = jnp.dot(x_ref[...], w1_ref[...],
                 preferred_element_type=jnp.float32) + b1_ref[...]
    h1 = jnp.maximum(h1, 0.0).astype(w2_ref.dtype)

    # layer2 + ReLU
    h2 = jnp.dot(h1, w2_ref[...],
                 preferred_element_type=jnp.float32) + b2_ref[...]
    h2 = jnp.maximum(h2, 0.0).astype(wh_ref.dtype)

    # fused heads: one matmul produces [mu | log_std] in a lane-dense slab
    heads = jnp.dot(h2, wh_ref[...],
                    preferred_element_type=jnp.float32) + bh_ref[...]

    # lanes >= std_start hold log_std -> clamp + exp (EUP); lanes < std_start
    # hold mu and pass through.  Single full-width unmasked store.
    lane = jax.lax.broadcasted_iota(jnp.int32, heads.shape, dimension=1)
    std_vals = jnp.exp(jnp.clip(heads, -20.0, 2.0))
    out_ref[...] = jnp.where(lane >= std_start, std_vals, heads)


def prepare_params(params, input_dim, output_dim, use_bf16=False):
    """Fuse the two heads into one lane-dense weight; optionally cast to bf16.

    Weights are stored (in, out).  Biases stay f32 (added to f32 accumulators).
    """
    w1, b1, w2, b2, wmu, bmu, wls, bls = params
    assert w1.shape == (input_dim, HIDDEN)
    out_w, std_start = _head_layout(output_dim)

    wh = jnp.zeros((HIDDEN, out_w), jnp.float32)
    wh = wh.at[:, :output_dim].set(wmu)
    wh = wh.at[:, std_start:std_start + output_dim].set(wls)
    bh = jnp.zeros((1, out_w), jnp.float32)
    bh = bh.at[:, :output_dim].set(bmu)
    bh = bh.at[:, std_start:std_start + output_dim].set(bls)

    cdt = jnp.bfloat16 if use_bf16 else jnp.float32
    return (w1.astype(cdt), b1.astype(jnp.float32),
            w2.astype(cdt), b2.astype(jnp.float32),
            wh.astype(cdt), bh.astype(jnp.float32))


def _batch_tiling(B, sub):
    """Pick a batch tile: multiple of `sub`, <= MAX_TB, >= 2 grid steps when
    B is large enough so the parallel axis can split across 2 TCs on v7x."""
    if B <= sub:
        return sub
    n_tiles = max(2, _cdiv(B, MAX_TB))
    if n_tiles > 2 and n_tiles % 2:
        n_tiles += 1                      # even step count shards evenly on v7x
    return _round_up(_cdiv(B, n_tiles), sub)


def policy_net_forward(x, prepared_params, output_dim):
    """Whole MLP forward in one Pallas kernel, batch tiled on a 1-D grid."""
    w1, b1, w2, b2, wh, bh = prepared_params
    B, input_dim = x.shape
    assert w1.shape[0] == input_dim
    out_w, std_start = _head_layout(output_dim)

    compute_dtype = w1.dtype
    sub = 16 if compute_dtype == jnp.bfloat16 else 8   # sublane packing
    tb = _batch_tiling(B, sub)
    b_pad = _round_up(B, tb)

    x_c = x.astype(compute_dtype)
    if b_pad != B:                         # pad rows only (no lane padding)
        x_c = jnp.pad(x_c, ((0, b_pad - B), (0, 0)))

    grid = (b_pad // tb,)

    flops = 2 * b_pad * (input_dim * HIDDEN + HIDDEN * HIDDEN + HIDDEN * out_w)
    bytes_accessed = int(
        sum(a.size * a.dtype.itemsize for a in (x_c, w1, b1, w2, b2, wh, bh))
        + b_pad * out_w * 4)
    cost = pl.CostEstimate(flops=flops,
                           transcendentals=b_pad * out_w,
                           bytes_accessed=bytes_accessed)

    out = pl.pallas_call(
        functools.partial(policy_net_kernel, std_start=std_start),
        out_shape=jax.ShapeDtypeStruct((b_pad, out_w), jnp.float32),
        grid_spec=pltpu.PrefetchScalarGridSpec(
            num_scalar_prefetch=0,
            grid=grid,
            in_specs=[
                pl.BlockSpec((tb, input_dim), lambda i: (i, 0)),      # x tile
                pl.BlockSpec((input_dim, HIDDEN), lambda i: (0, 0)),  # W1 (resident)
                pl.BlockSpec((1, HIDDEN), lambda i: (0, 0)),          # b1
                pl.BlockSpec((HIDDEN, HIDDEN), lambda i: (0, 0)),     # W2
                pl.BlockSpec((1, HIDDEN), lambda i: (0, 0)),          # b2
                pl.BlockSpec((HIDDEN, out_w), lambda i: (0, 0)),      # fused heads W
                pl.BlockSpec((1, out_w), lambda i: (0, 0)),           # fused heads b
            ],
            out_specs=pl.BlockSpec((tb, out_w), lambda i: (i, 0)),
        ),
        compiler_params=pltpu.CompilerParams(
            dimension_semantics=("parallel",)),
        cost_estimate=cost,
    )(x_c, w1, b1, w2, b2, wh, bh)

    mu = out[:B, :output_dim]
    std = out[:B, std_start:std_start + output_dim]
    return mu, std


def init_params(key, input_dim, output_dim, hidden=HIDDEN):
    """Deterministic synthetic parameters. Weights stored (in, out)."""
    ks = jax.random.split(key, 8)

    def lin(kw, kb, fan_in, fan_out):
        bound = 1.0 / jnp.sqrt(fan_in)
        w = jax.random.uniform(kw, (fan_in, fan_out), jnp.float32, -bound, bound)
        b = jax.random.uniform(kb, (1, fan_out), jnp.float32, -bound, bound)
        return w, b

    w1, b1 = lin(ks[0], ks[1], input_dim, hidden)
    w2, b2 = lin(ks[2], ks[3], hidden, hidden)
    wmu, bmu = lin(ks[4], ks[5], hidden, output_dim)
    wls, bls = lin(ks[6], ks[7], hidden, output_dim)
    return (w1, b1, w2, b2, wmu, bmu, wls, bls)


def policy_net_reference(x, params):
    """Plain-JAX reference of Policy_net.forward (returns mu, std)."""
    w1, b1, w2, b2, wmu, bmu, wls, bls = params
    h1 = jnp.maximum(x @ w1 + b1, 0.0)
    h2 = jnp.maximum(h1 @ w2 + b2, 0.0)
    mu = h2 @ wmu + bmu
    log_std = h2 @ wls + bls
    std = jnp.exp(jnp.clip(log_std, -20.0, 2.0))
    return mu, std


if __name__ == "__main__":
    key = jax.random.PRNGKey(0)
    k_x, k_p, k_x2 = jax.random.split(key, 3)

    batch = 8
    input_dim = 32
    output_dim = 8

    x = jax.random.normal(k_x, (batch, input_dim), jnp.float32)
    params = init_params(k_p, input_dim, output_dim)

    # --- f32 path: exact parity with the reference -------------------------
    prepared = prepare_params(params, input_dim, output_dim)
    mu, std = policy_net_forward(x, prepared, output_dim)
    jax.block_until_ready((mu, std))

    mu_ref, std_ref = policy_net_reference(x, params)
    assert mu.shape == (batch, output_dim) and std.shape == (batch, output_dim)
    assert jnp.allclose(mu, mu_ref, atol=1e-5, rtol=1e-5)
    assert jnp.allclose(std, std_ref, atol=1e-5, rtol=1e-5)

    # --- multi-tile grid (exercises batch tiling + 2-step parallel axis) ---
    x2 = jax.random.normal(k_x2, (40, input_dim), jnp.float32)
    mu2, std2 = policy_net_forward(x2, prepared, output_dim)
    jax.block_until_ready((mu2, std2))
    mu2_ref, std2_ref = policy_net_reference(x2, params)
    assert jnp.allclose(mu2, mu2_ref, atol=1e-5, rtol=1e-5)
    assert jnp.allclose(std2, std2_ref, atol=1e-5, rtol=1e-5)

    # --- bf16 fast path (halves DMA bytes; looser tolerance vs f32 ref) ----
    prepared_bf16 = prepare_params(params, input_dim, output_dim, use_bf16=True)
    mu_b, std_b = policy_net_forward(x, prepared_bf16, output_dim)
    jax.block_until_ready((mu_b, std_b))
    assert jnp.allclose(mu_b, mu_ref, atol=1e-1, rtol=1e-1)
    assert jnp.allclose(std_b, std_ref, atol=1e-1, rtol=1e-1)

    print("KERNEL_OK")
</pallas_src>

<mosaic_0001>
module attributes {stable_mosaic.version = 11 : i64} {
  func.func @policy_net_kernel(%arg0: i32, %arg1: memref<8x32xf32, #tpu.memory_space<vmem>>, %arg2: memref<32x256xf32, #tpu.memory_space<vmem>>, %arg3: memref<1x256xf32, #tpu.memory_space<vmem>>, %arg4: memref<256x256xf32, #tpu.memory_space<vmem>>, %arg5: memref<1x256xf32, #tpu.memory_space<vmem>>, %arg6: memref<256x128xf32, #tpu.memory_space<vmem>>, %arg7: memref<1x128xf32, #tpu.memory_space<vmem>>, %arg8: memref<8x128xf32, #tpu.memory_space<vmem>>) attributes {dimension_semantics = [#tpu.dimension_semantics<parallel>], iteration_bounds = array<i64: 1>, scalar_prefetch = 0 : i64, scratch_operands = 0 : i64, tpu.core_type = #tpu.core_type<tc>, window_params = [{transform_indices = @transform_0, window_bounds = array<i64: 8, 32>}, {pipeline_mode = #tpu.pipeline_mode<synchronous>, transform_indices = @transform_1, window_bounds = array<i64: 32, 256>}, {pipeline_mode = #tpu.pipeline_mode<synchronous>, transform_indices = @transform_2, window_bounds = array<i64: 1, 256>}, {pipeline_mode = #tpu.pipeline_mode<synchronous>, transform_indices = @transform_3, window_bounds = array<i64: 256, 256>}, {pipeline_mode = #tpu.pipeline_mode<synchronous>, transform_indices = @transform_4, window_bounds = array<i64: 1, 256>}, {pipeline_mode = #tpu.pipeline_mode<synchronous>, transform_indices = @transform_5, window_bounds = array<i64: 256, 128>}, {pipeline_mode = #tpu.pipeline_mode<synchronous>, transform_indices = @transform_6, window_bounds = array<i64: 1, 128>}, {transform_indices = @transform_7, window_bounds = array<i64: 8, 128>}]} {
    %c0 = arith.constant 0 : index
    %c0_0 = arith.constant 0 : index
    %0 = vector.load %arg1[%c0, %c0_0] : memref<8x32xf32, #tpu.memory_space<vmem>>, vector<8x32xf32>
    %c0_1 = arith.constant 0 : index
    %c0_2 = arith.constant 0 : index
    %1 = vector.load %arg2[%c0_1, %c0_2] : memref<32x256xf32, #tpu.memory_space<vmem>>, vector<32x256xf32>
    %cst = arith.constant dense<0.000000e+00> : vector<8x256xf32>
    %2 = tpu.matmul %0, %1, %cst {dimension_numbers = #tpu.dot_dimension_numbers<[1], [0], [0], [1], [0, 0, 1, 1], [], []>} : vector<8x32xf32>, vector<32x256xf32>, vector<8x256xf32> -> vector<8x256xf32>
    %c0_3 = arith.constant 0 : index
    %c0_4 = arith.constant 0 : index
    %3 = vector.load %arg3[%c0_3, %c0_4] : memref<1x256xf32, #tpu.memory_space<vmem>>, vector<1x256xf32>
    %4 = vector.broadcast %3 : vector<1x256xf32> to vector<8x256xf32>
    %5 = arith.addf %2, %4 : vector<8x256xf32>
    %cst_5 = arith.constant 0.000000e+00 : f32
    %6 = vector.broadcast %cst_5 : f32 to vector<8x256xf32>
    %7 = arith.maximumf %5, %6 : vector<8x256xf32>
    %c0_6 = arith.constant 0 : index
    %c0_7 = arith.constant 0 : index
    %8 = vector.load %arg4[%c0_6, %c0_7] : memref<256x256xf32, #tpu.memory_space<vmem>>, vector<256x256xf32>
    %cst_8 = arith.constant dense<0.000000e+00> : vector<8x256xf32>
    %9 = tpu.matmul %7, %8, %cst_8 {dimension_numbers = #tpu.dot_dimension_numbers<[1], [0], [0], [1], [0, 0, 1, 1], [], []>} : vector<8x256xf32>, vector<256x256xf32>, vector<8x256xf32> -> vector<8x256xf32>
    %c0_9 = arith.constant 0 : index
    %c0_10 = arith.constant 0 : index
    %10 = vector.load %arg5[%c0_9, %c0_10] : memref<1x256xf32, #tpu.memory_space<vmem>>, vector<1x256xf32>
    %11 = vector.broadcast %10 : vector<1x256xf32> to vector<8x256xf32>
    %12 = arith.addf %9, %11 : vector<8x256xf32>
    %cst_11 = arith.constant 0.000000e+00 : f32
    %13 = vector.broadcast %cst_11 : f32 to vector<8x256xf32>
    %14 = arith.maximumf %12, %13 : vector<8x256xf32>
    %c0_12 = arith.constant 0 : index
    %c0_13 = arith.constant 0 : index
    %15 = vector.load %arg6[%c0_12, %c0_13] : memref<256x128xf32, #tpu.memory_space<vmem>>, vector<256x128xf32>
    %cst_14 = arith.constant dense<0.000000e+00> : vector<8x128xf32>
    %16 = tpu.matmul %14, %15, %cst_14 {dimension_numbers = #tpu.dot_dimension_numbers<[1], [0], [0], [1], [0, 0, 1, 1], [], []>} : vector<8x256xf32>, vector<256x128xf32>, vector<8x128xf32> -> vector<8x128xf32>
    %c0_15 = arith.constant 0 : index
    %c0_16 = arith.constant 0 : index
    %17 = vector.load %arg7[%c0_15, %c0_16] : memref<1x128xf32, #tpu.memory_space<vmem>>, vector<1x128xf32>
    %18 = vector.broadcast %17 : vector<1x128xf32> to vector<8x128xf32>
    %19 = arith.addf %16, %18 : vector<8x128xf32>
    %20 = tpu.iota {dimensions = array<i32: 1>} : vector<8x128xi32>
    %cst_17 = arith.constant -2.000000e+01 : f32
    %cst_18 = arith.constant 2.000000e+00 : f32
    %21 = vector.broadcast %cst_17 : f32 to vector<8x128xf32>
    %22 = arith.maximumf %21, %19 : vector<8x128xf32>
    %23 = vector.broadcast %cst_18 : f32 to vector<8x128xf32>
    %24 = arith.minimumf %23, %22 : vector<8x128xf32>
    %25 = math.exp %24 : vector<8x128xf32>
    %c8_i32 = arith.constant 8 : i32
    %26 = vector.broadcast %c8_i32 : i32 to vector<8x128xi32>
    %27 = arith.cmpi sge, %20, %26 : vector<8x128xi32>
    %28 = arith.select %27, %25, %19 : vector<8x128xi1>, vector<8x128xf32>
    %c0_19 = arith.constant 0 : index
    %c0_20 = arith.constant 0 : index
    %29 = vector.load %arg8[%c0_19, %c0_20] : memref<8x128xf32, #tpu.memory_space<vmem>>, vector<8x128xf32>
    tpu.vector_store %arg8[%c0_19, %c0_20], %28 {strides = array<i32>} : memref<8x128xf32, #tpu.memory_space<vmem>>, vector<8x128xf32>,
    return
  }
  func.func @transform_0(%arg0: i32) -> (i32, i32) {
    %c0_i32 = arith.constant 0 : i32
    %c0_i32_0 = arith.constant 0 : i32
    return %arg0, %c0_i32 : i32, i32
  }
  func.func @transform_1(%arg0: i32) -> (i32, i32) {
    %c0_i32 = arith.constant 0 : i32
    %c0_i32_0 = arith.constant 0 : i32
    %c0_i32_1 = arith.constant 0 : i32
    return %c0_i32, %c0_i32_0 : i32, i32
  }
  func.func @transform_2(%arg0: i32) -> (i32, i32) {
    %c0_i32 = arith.constant 0 : i32
    %c0_i32_0 = arith.constant 0 : i32
    %c0_i32_1 = arith.constant 0 : i32
    return %c0_i32, %c0_i32_0 : i32, i32
  }
  func.func @transform_3(%arg0: i32) -> (i32, i32) {
    %c0_i32 = arith.constant 0 : i32
    %c0_i32_0 = arith.constant 0 : i32
    %c0_i32_1 = arith.constant 0 : i32
    return %c0_i32, %c0_i32_0 : i32, i32
  }
  func.func @transform_4(%arg0: i32) -> (i32, i32) {
    %c0_i32 = arith.constant 0 : i32
    %c0_i32_0 = arith.constant 0 : i32
    %c0_i32_1 = arith.constant 0 : i32
    return %c0_i32, %c0_i32_0 : i32, i32
  }
  func.func @transform_5(%arg0: i32) -> (i32, i32) {
    %c0_i32 = arith.constant 0 : i32
    %c0_i32_0 = arith.constant 0 : i32
    %c0_i32_1 = arith.constant 0 : i32
    return %c0_i32, %c0_i32_0 : i32, i32
  }
  func.func @transform_6(%arg0: i32) -> (i32, i32) {
    %c0_i32 = arith.constant 0 : i32
    %c0_i32_0 = arith.constant 0 : i32
    %c0_i32_1 = arith.constant 0 : i32
    return %c0_i32, %c0_i32_0 : i32, i32
  }
  func.func @transform_7(%arg0: i32) -> (i32, i32) {
    %c0_i32 = arith.constant 0 : i32
    %c0_i32_0 = arith.constant 0 : i32
    return %arg0, %c0_i32 : i32, i32
  }
}

</mosaic_0001>

<bundles_post_ra>
// kernel: tpu_custom_call.1
= control target key start
LH: loop header
LB: loop body
LE: loop exit
PB: predicated region body
PF: predicated region fallthrough
CT: control target
= control target key end

     0   :  { %12 = vsyncpa [#allocation3], 0  ;;  %s858_s0 = inlined_call_operand.hbm [shape: f32[8,32], index: 0, kind: input, shape index: {}]   ;;  %s859_s1 = inlined_call_operand.hbm [shape: f32[32,256], index: 1, kind: input, shape index: {}]   ;;  %s860_s2 = inlined_call_operand.vmem [shape: f32[1,256], index: 2, kind: input, shape index: {}]   ;;  %s861_s3 = inlined_call_operand.hbm [shape: f32[256,256], index: 3, kind: input, shape index: {}]   ;;  %s862_s4 = inlined_call_operand.vmem [shape: f32[1,256], index: 4, kind: input, shape index: {}]   ;;  %s863_s5 = inlined_call_operand.hbm [shape: f32[256,128], index: 5, kind: input, shape index: {}]   ;;  %s864_s6 = inlined_call_operand.vmem [shape: f32[1,128], index: 6, kind: input, shape index: {}]   ;;  %s865_s7 = inlined_call_operand.hbm [shape: f32[8,128], index: 7, kind: output, shape index: {}]  }
   0x1   :  { %13 = vsyncpa [#allocation6], 0 }
   0x2   :  { %14 = vsyncpa [#allocation9], 0 }
   0x3   :  { %15 = vsyncpa [#allocation4], 0  ;;  %s733_s24 = smov [#allocation5]   ;;  %s615_s28 = scalar_lea.hbm %s859_s1, 1024 }
   0x4   :  { %s31_s25 = sshll.u32 %s733_s24, 4  ;;  %p616_p0 = scmp.ne.s32.totalorder %s859_s1, %s615_s28  ;;  %s32_s25 = int_to_ptr.vmem [resolvable:$true] %s31_s25 }
   0x5   :  { %p619_p1 = scmp.lt.u32.totalorder %s615_s28, %s859_s1 }
   0x7   :  { %p621_p2 = pnand %p619_p1, %p616_p0 }
   0x9   :  { %624 = shalt.err (!%p621_p2)
}
   0xa   :  { %s625_s10 = scalar_lea.vmem %s32_s25, 1024  ;;  %p630_p4 = scmp.lt.s32.totalorder %s32_s25, %s32_s25 }
   0xb   :  { %p626_p3 = scmp.ne.s32.totalorder %s32_s25, %s625_s10  ;;  %p631_p5 = scmp.lt.s32.totalorder %s625_s10, %s625_s10 }
   0xd   :  { %p632_p6 = por %p631_p5, %p630_p4 }
   0xf   :  { %p633_p7 = pnand %p632_p6, %p626_p3 }
  0x11   :  { %636 = shalt.err (!%p633_p7)
}
  0x12   :  { %s734_s11 = smov 256   ;;  %s735_s12 = smov 16  }
  0x13   :  { %37 = dma.hbm_to_vmem [thread:$0]  %s859_s1, 1024, %s32_s25, [#allocation6], %s734_s11, %s734_s11, %s735_s12  }
  0x14   :  { %s736_s15 = smov [#allocation2]   ;;  %s737_s17 = smov [#allocation7]  }
  0x15   :  { %s22_s16 = sshll.u32 %s736_s15, 4  ;;  %s45_s18 = sshll.u32 %s737_s17, 4  ;;  %s23_s16 = int_to_ptr.vmem [resolvable:$true] %s22_s16  ;;  %s46_s18 = int_to_ptr.vmem [resolvable:$true] %s45_s18 }
  0x16   :  { %s637_s21 = scalar_lea.hbm %s858_s0, 128 }
  0x17   :  { %p638_p8 = scmp.ne.s32.totalorder %s858_s0, %s637_s21  ;;  %p641_p9 = scmp.lt.u32.totalorder %s637_s21, %s858_s0 }
  0x19   :  { %p643_p10 = pnand %p641_p9, %p638_p8 }
  0x1b   :  { %646 = shalt.err (!%p643_p10)
}
  0x1c   :  { %s647_s1 = scalar_lea.vmem %s23_s16, 128  ;;  %p652_p12 = scmp.lt.s32.totalorder %s23_s16, %s23_s16 }
  0x1d   :  { %p648_p11 = scmp.ne.s32.totalorder %s23_s16, %s647_s1  ;;  %p653_p13 = scmp.lt.s32.totalorder %s647_s1, %s647_s1 }
  0x1f   :  { %p654_p0 = por %p653_p13, %p652_p12 }
  0x21   :  { %p655_p1 = pnand %p654_p0, %p648_p11 }
  0x23   :  { %658 = shalt.err (!%p655_p1)
}
  0x24   :  { %25 = dma.hbm_to_vmem [thread:$0]  %s858_s0, 128, %s23_s16, [#allocation3]  }
  0x25   :  { %s659_s30 = scalar_lea.hbm %s861_s3, 8192 }
  0x26   :  { %p660_p2 = scmp.ne.s32.totalorder %s861_s3, %s659_s30  ;;  %p663_p3 = scmp.lt.u32.totalorder %s659_s30, %s861_s3 }
  0x28   :  { %p665_p4 = pnand %p663_p3, %p660_p2 }
  0x2a   :  { %668 = shalt.err (!%p665_p4)
}
  0x2b   :  { %s669_s14 = scalar_lea.vmem %s46_s18, 8192  ;;  %p674_p6 = scmp.lt.s32.totalorder %s46_s18, %s46_s18 }
  0x2c   :  { %p670_p5 = scmp.ne.s32.totalorder %s46_s18, %s669_s14  ;;  %p675_p7 = scmp.lt.s32.totalorder %s669_s14, %s669_s14 }
  0x2e   :  { %p676_p8 = por %p675_p7, %p674_p6 }
  0x30   :  { %p677_p9 = pnand %p676_p8, %p670_p5 }
  0x32   :  { %680 = shalt.err (!%p677_p9)
}
  0x33   :  { %51 = dma.hbm_to_vmem [thread:$0]  %s861_s3, 8192, %s46_s18, [#allocation6], %s734_s11, %s734_s11, %s735_s12  }
  0x34   :  { %s738_s16 = smov [#allocation8]   ;;  %s681_s21 = scalar_lea.hbm %s863_s5, 4096 }
  0x35   :  { %s59_s17 = sshll.u32 %s738_s16, 4  ;;  %p682_p10 = scmp.ne.s32.totalorder %s863_s5, %s681_s21  ;;  %s60_s17 = int_to_ptr.vmem [resolvable:$true] %s59_s17 }
  0x36   :  { %p685_p11 = scmp.lt.u32.totalorder %s681_s21, %s863_s5 }
  0x38   :  { %p687_p12 = pnand %p685_p11, %p682_p10 }
  0x3a   :  { %690 = shalt.err (!%p687_p12)
}
  0x3b   :  { %s691_s1 = scalar_lea.vmem %s60_s17, 4096  ;;  %p696_p0 = scmp.lt.s32.totalorder %s60_s17, %s60_s17 }
  0x3c   :  { %p692_p13 = scmp.ne.s32.totalorder %s60_s17, %s691_s1  ;;  %p697_p1 = scmp.lt.s32.totalorder %s691_s1, %s691_s1 }
  0x3e   :  { %p698_p2 = por %p697_p1, %p696_p0 }
  0x40   :  { %p699_p3 = pnand %p698_p2, %p692_p13 }
  0x42   :  { %702 = shalt.err (!%p699_p3)
}
  0x43   :  { %s739_s3 = smov 128   ;;  %s740_s11 = smov 8  }
  0x44   :  { %65 = dma.hbm_to_vmem [thread:$0]  %s863_s5, 4096, %s60_s17, [#allocation9], %s739_s3, %s739_s3, %s740_s11  }
  0x45   :  { %725 = dma.done.wait [#allocation3], 128  }
  0x46   :  { %726 = vsyncadd [#allocation3], 4294967168 }
  0x47   :  { %727 = dma.done.wait [#allocation6], 9216  }
  0x48   :  { %728 = vsyncadd [#allocation6], 4294958080 }
  0x49   :  { %729 = dma.done.wait [#allocation9], 4096  }
  0x4a   :  { %730 = vsyncadd [#allocation9], 4294963200  ;;  %v741_v0 = vmov 0.0   ;;  %v82_v1 = vld [vmem:[#allocation5 + $0x8] sm:$0xff]  ;;  %v84_v2 = vld [vmem:[#allocation5 + $0x18] sm:$0xff]  ;;  %vm101_vm0 = vcmask 261120  }
  0x4b   :  { %169 = vmatprep.mubr.f32.mxu0 %v741_v0  ;;  %v81_v3 = vld [vmem:[#allocation5] sm:$0xff]  ;;  %v499_v4 = vpack.c.bf16 %v84_v2, %v82_v1  ;;  %v83_v5 = vld [vmem:[#allocation5 + $0x10] sm:$0xff]  ;;  %v86_v6 = vld [vmem:[#allocation5 + $0x28] sm:$0xff] }
  0x4c   :  { %v88_v7 = vld [vmem:[#allocation5 + $0x38] sm:$0xff]  ;;  %v501_v8 = vpack.c.bf16 %v83_v5, %v81_v3  ;;  %v85_v10 = vld [vmem:[#allocation5 + $0x20] sm:$0xff]  ;;  %v87_v11 = vld [vmem:[#allocation5 + $0x30] sm:$0xff] }
  0x4d   :  { %v503_v9 = vpack.c.bf16 %v88_v7, %v86_v6  ;;  %500 = vmatprep.subr.bf16.mxu0 %v499_v4  ;;  %v179_v12 = vld [vmem:[#allocation7 + $0x8] sm:$0xff]  ;;  %v181_v13 = vld [vmem:[#allocation7 + $0x18] sm:$0xff]  ;;  %v178_v14 = vld [vmem:[#allocation7] sm:$0xff]  ;;  %v505_v15 = vpack.c.bf16 %v87_v11, %v85_v10 }
  0x4e   :  { %502 = vmatpush1.bf16.msra.mxu0 %v501_v8  ;;  %v507_v16 = vpack.c.bf16 %v181_v13, %v179_v12  ;;  %v180_v17 = vld [vmem:[#allocation7 + $0x10] sm:$0xff]  ;;  %v183_v18 = vld [vmem:[#allocation7 + $0x28] sm:$0xff]  ;;  %v185_v19 = vld [vmem:[#allocation7 + $0x38] sm:$0xff] }
  0x4f   :  { %504 = vmatprep.subr.bf16.mxu0 %v503_v9  ;;  %v509_v20 = vpack.c.bf16 %v180_v17, %v178_v14  ;;  %v511_v21 = vpack.c.bf16 %v185_v19, %v183_v18  ;;  %v182_v22 = vld [vmem:[#allocation7 + $0x20] sm:$0xff]  ;;  %v184_v23 = vld [vmem:[#allocation7 + $0x30] sm:$0xff]  ;;  %v187_v24 = vld [vmem:[#allocation7 + $0x48] sm:$0xff] }
  0x50   :  { %508 = vmatprep.subr.bf16.mxu1 %v507_v16  ;;  %v189_v25 = vld [vmem:[#allocation7 + $0x58] sm:$0xff]  ;;  %v513_v26 = vpack.c.bf16 %v184_v23, %v182_v22  ;;  %v186_v29 = vld [vmem:[#allocation7 + $0x40] sm:$0xff]  ;;  %v188_v30 = vld [vmem:[#allocation7 + $0x50] sm:$0xff] }
  0x51   :  { %510 = vmatpush1.bf16.msra.mxu1 %v509_v20  ;;  %v80_v27 = vld [vmem:[#allocation2] sm:$0xff]  ;;  %v515_v28 = vpack.c.bf16 %v189_v25, %v187_v24  ;;  %v191_v31 = vld [vmem:[#allocation7 + $0x68] sm:$0xff]  ;;  %v517_v33 = vpack.c.bf16 %v188_v30, %v186_v29  ;;  %v190_v35 = vld [vmem:[#allocation7 + $0x60] sm:$0xff] }
  0x52   :  { %506 = vmatpush1.bf16.msra.mxu0 %v505_v15  ;;  %512 = vmatprep.subr.bf16.mxu1 %v511_v21  ;;  %v193_v32 = vld [vmem:[#allocation7 + $0x78] sm:$0xff]  ;;  %v192_v36 = vld [vmem:[#allocation7 + $0x70] sm:$0xff]  ;;  %v195_v37 = vld [vmem:[#allocation7 + $0x88] sm:$0xff] }
  0x53   :  { %v519_v34 = vpack.c.bf16 %v193_v32, %v191_v31  ;;  %v197_v38 = vld [vmem:[#allocation7 + $0x98] sm:$0xff]  ;;  %v521_v39 = vpack.c.bf16 %v192_v36, %v190_v35  ;;  %v194_v41 = vld [vmem:[#allocation7 + $0x80] sm:$0xff]  ;;  %v196_v42 = vld [vmem:[#allocation7 + $0x90] sm:$0xff] }
  0x54   :  { %v523_v40 = vpack.c.bf16 %v197_v38, %v195_v37  ;;  %v199_v43 = vld [vmem:[#allocation7 + $0xa8] sm:$0xff]  ;;  %v201_v44 = vld [vmem:[#allocation7 + $0xb8] sm:$0xff]  ;;  %v525_v45 = vpack.c.bf16 %v196_v42, %v194_v41  ;;  %v198_v47 = vld [vmem:[#allocation7 + $0xa0] sm:$0xff] }
  0x55   :  { %462 = vmatmul.mubr.msk.f32.vlgmr.msra.gmra.mrb[0].mxu0 %vm101_vm0, %v80_v27  ;;  %514 = vmatpush1.bf16.msra.mxu1 %v513_v26  ;;  %v527_v46 = vpack.c.bf16 %v201_v44, %v199_v43  ;;  %v200_v48 = vld [vmem:[#allocation7 + $0xb0] sm:$0xff]  ;;  %v203_v49 = vld [vmem:[#allocation7 + $0xc8] sm:$0xff]  ;;  %v205_v50 = vld [vmem:[#allocation7 + $0xd8] sm:$0xff] }
  0x56   :  { %516 = vmatprep.subr.bf16.mxu1 %v515_v28  ;;  %v529_v51 = vpack.c.bf16 %v200_v48, %v198_v47  ;;  %v531_v52 = vpack.c.bf16 %v205_v50, %v203_v49  ;;  %v202_v53 = vld [vmem:[#allocation7 + $0xc0] sm:$0xff]  ;;  %v204_v54 = vld [vmem:[#allocation7 + $0xd0] sm:$0xff]  ;;  %v207_v55 = vld [vmem:[#allocation7 + $0xe8] sm:$0xff] }
  0x57   :  { %v209_v56 = vld [vmem:[#allocation7 + $0xf8] sm:$0xff]  ;;  %v533_v57 = vpack.c.bf16 %v204_v54, %v202_v53  ;;  %v206_v59 = vld [vmem:[#allocation7 + $0xe0] sm:$0xff]  ;;  %v208_v60 = vld [vmem:[#allocation7 + $0xf0] sm:$0xff] }
  0x58   :  { %v535_v58 = vpack.c.bf16 %v209_v56, %v207_v55  ;;  %v211_v61 = vld [vmem:[#allocation7 + $0x108] sm:$0xff]  ;;  %v213_v62 = vld [vmem:[#allocation7 + $0x118] sm:$0xff]  ;;  %v537_v63 = vpack.c.bf16 %v208_v60, %v206_v59  ;;  %v210_v1 = vld [vmem:[#allocation7 + $0x100] sm:$0xff] }
  0x59   :  { %518 = vmatpush1.bf16.msra.mxu1 %v517_v33  ;;  %v539_v0 = vpack.c.bf16 %v213_v62, %v211_v61  ;;  %v212_v2 = vld [vmem:[#allocation7 + $0x110] sm:$0xff]  ;;  %v215_v3 = vld [vmem:[#allocation7 + $0x128] sm:$0xff]  ;;  %v217_v4 = vld [vmem:[#allocation7 + $0x138] sm:$0xff] }
  0x5a   :  { %520 = vmatprep.subr.bf16.mxu1 %v519_v34  ;;  %v541_v5 = vpack.c.bf16 %v212_v2, %v210_v1  ;;  %v543_v6 = vpack.c.bf16 %v217_v4, %v215_v3  ;;  %v214_v7 = vld [vmem:[#allocation7 + $0x120] sm:$0xff]  ;;  %v216_v8 = vld [vmem:[#allocation7 + $0x130] sm:$0xff]  ;;  %v219_v9 = vld [vmem:[#allocation7 + $0x148] sm:$0xff] }
  0x5b   :  { %v221_v10 = vld [vmem:[#allocation7 + $0x158] sm:$0xff]  ;;  %v545_v11 = vpack.c.bf16 %v216_v8, %v214_v7  ;;  %v218_v13 = vld [vmem:[#allocation7 + $0x140] sm:$0xff]  ;;  %v220_v14 = vld [vmem:[#allocation7 + $0x150] sm:$0xff] }
  0x5c   :  { %v547_v12 = vpack.c.bf16 %v221_v10, %v219_v9  ;;  %v223_v15 = vld [vmem:[#allocation7 + $0x168] sm:$0xff]  ;;  %v225_v16 = vld [vmem:[#allocation7 + $0x178] sm:$0xff]  ;;  %v549_v17 = vpack.c.bf16 %v220_v14, %v218_v13  ;;  %v222_v19 = vld [vmem:[#allocation7 + $0x160] sm:$0xff] }
  0x5d   :  { %522 = vmatpush1.bf16.msra.mxu1 %v521_v39  ;;  %v551_v18 = vpack.c.bf16 %v225_v16, %v223_v15  ;;  %v224_v20 = vld [vmem:[#allocation7 + $0x170] sm:$0xff]  ;;  %v227_v21 = vld [vmem:[#allocation7 + $0x188] sm:$0xff]  ;;  %v229_v22 = vld [vmem:[#allocation7 + $0x198] sm:$0xff] }
  0x5e   :  { %524 = vmatprep.subr.bf16.mxu1 %v523_v40  ;;  %v553_v23 = vpack.c.bf16 %v224_v20, %v222_v19  ;;  %v555_v24 = vpack.c.bf16 %v229_v22, %v227_v21  ;;  %v226_v25 = vld [vmem:[#allocation7 + $0x180] sm:$0xff]  ;;  %v228_v26 = vld [vmem:[#allocation7 + $0x190] sm:$0xff]  ;;  %v231_v27 = vld [vmem:[#allocation7 + $0x1a8] sm:$0xff]  ;;  %v91_v21 = vlaneseq }
  0x5f   :  { %v233_v28 = vld [vmem:[#allocation7 + $0x1b8] sm:$0xff]  ;;  %v557_v29 = vpack.c.bf16 %v228_v26, %v226_v25  ;;  %v230_v31 = vld [vmem:[#allocation7 + $0x1a0] sm:$0xff]  ;;  %v232_v32 = vld [vmem:[#allocation7 + $0x1b0] sm:$0xff] }
  0x60   :  { %v559_v30 = vpack.c.bf16 %v233_v28, %v231_v27  ;;  %v235_v33 = vld [vmem:[#allocation7 + $0x1c8] sm:$0xff]  ;;  %v237_v34 = vld [vmem:[#allocation7 + $0x1d8] sm:$0xff]  ;;  %v561_v35 = vpack.c.bf16 %v232_v32, %v230_v31  ;;  %v234_v37 = vld [vmem:[#allocation7 + $0x1c0] sm:$0xff]  ;;  %v92_v22 = vshrl.u32 %v91_v21, 7 }
  0x61   :  { %526 = vmatpush1.bf16.msra.mxu1 %v525_v45  ;;  %v563_v36 = vpack.c.bf16 %v237_v34, %v235_v33  ;;  %v236_v38 = vld [vmem:[#allocation7 + $0x1d0] sm:$0xff]  ;;  %v239_v40 = vld [vmem:[#allocation7 + $0x1e8] sm:$0xff]  ;;  %v241_v41 = vld [vmem:[#allocation7 + $0x1f8] sm:$0xff] }
  0x62   :  { %528 = vmatprep.subr.bf16.mxu1 %v527_v46  ;;  %v565_v39 = vpack.c.bf16 %v236_v38, %v234_v37  ;;  %v567_v42 = vpack.c.bf16 %v241_v41, %v239_v40  ;;  %v238_v43 = vld [vmem:[#allocation7 + $0x1e0] sm:$0xff]  ;;  %v240_v44 = vld [vmem:[#allocation7 + $0x1f0] sm:$0xff]  ;;  %v344_v47 = vld [vmem:[#allocation8 + $0x88] sm:$0xff]  ;;  %v97_v25 = vsub.s32 1, %v92_v22 }
  0x63   :  { %v569_v45 = vpack.c.bf16 %v240_v44, %v238_v43  ;;  %v343_v46 = vld [vmem:[#allocation8 + $0x80] sm:$0xff]  ;;  %v328_v50 = vld [vmem:[#allocation8 + $0x8] sm:$0xff]  ;;  %v329_v55 = vld [vmem:[#allocation8 + $0x10] sm:$0xff] }
  0x64   :  { %v327_v48 = vld [vmem:[#allocation8] sm:$0xff]  ;;  %v571_v49 = vpack.c.bf16 %v344_v47, %v343_v46  ;;  %v330_v56 = vld [vmem:[#allocation8 + $0x18] sm:$0xff]  ;;  %v332_v62 = vld [vmem:[#allocation8 + $0x28] sm:$0xff] }
  0x65   :  { %530 = vmatpush1.bf16.msra.mxu1 %v529_v51  ;;  %v345_v51 = vld [vmem:[#allocation8 + $0x90] sm:$0xff]  ;;  %v573_v53 = vpack.c.bf16 %v328_v50, %v327_v48  ;;  %v577_v59 = vpack.c.bf16 %v330_v56, %v329_v55  ;;  %v331_v61 = vld [vmem:[#allocation8 + $0x20] sm:$0xff]  ;;  %v334_v4 = vld [vmem:[#allocation8 + $0x38] sm:$0xff] }
  0x66   :  { %532 = vmatprep.subr.bf16.mxu1 %v531_v52  ;;  %v346_v52 = vld [vmem:[#allocation8 + $0x98] sm:$0xff]  ;;  %572 = vmatprep.subr.bf16.mxu0 %v571_v49  ;;  %v581_v1 = vpack.c.bf16 %v332_v62, %v331_v61  ;;  %v333_v3 = vld [vmem:[#allocation8 + $0x30] sm:$0xff]  ;;  %v335_v9 = vld [vmem:[#allocation8 + $0x40] sm:$0xff] }
  0x67   :  { %v575_v54 = vpack.c.bf16 %v346_v52, %v345_v51  ;;  %574 = vmatpush3.bf16.msra.mxu0 %v573_v53  ;;  %v585_v7 = vpack.c.bf16 %v334_v4, %v333_v3  ;;  %v336_v10 = vld [vmem:[#allocation8 + $0x48] sm:$0xff]  ;;  %v337_v15 = vld [vmem:[#allocation8 + $0x50] sm:$0xff]  ;;  %v338_v16 = vld [vmem:[#allocation8 + $0x58] sm:$0xff] }
  0x68   :  { %v589_v13 = vpack.c.bf16 %v336_v10, %v335_v9  ;;  %v593_v19 = vpack.c.bf16 %v338_v16, %v337_v15  ;;  %v339_v34 = vld [vmem:[#allocation8 + $0x60] sm:$0xff]  ;;  %v357_v37 = vld [vmem:[#allocation8 + $0xf0] sm:$0xff]  ;;  %v358_v38 = vld [vmem:[#allocation8 + $0xf8] sm:$0xff] }
  0x69   :  { %534 = vmatpush1.bf16.msra.mxu1 %v533_v57  ;;  %v347_v57 = vld [vmem:[#allocation8 + $0xa0] sm:$0xff]  ;;  %576 = vmatprep.subr.bf16.mxu0 %v575_v54  ;;  %v341_v40 = vld [vmem:[#allocation8 + $0x70] sm:$0xff]  ;;  %v342_v41 = vld [vmem:[#allocation8 + $0x78] sm:$0xff] }
  0x6a   :  { %536 = vmatprep.subr.bf16.mxu1 %v535_v58  ;;  %v348_v58 = vld [vmem:[#allocation8 + $0xa8] sm:$0xff]  ;;  %v242_v43 = vld [vmem:[%s862_s4] sm:$0x3]  ;;  %s742_s4 = smov [#allocation10]  }
  0x6b   :  { %v579_v60 = vpack.c.bf16 %v348_v58, %v347_v57  ;;  %578 = vmatpush3.bf16.msra.mxu0 %v577_v59  ;;  %v463_v53 = vld [vmem:[%s864_s6] ss:$0 sm:$0xff]  ;;  %s451_s30 = sshll.u32 %s742_s4, 4  ;;  %s452_s30 = int_to_ptr.vmem [resolvable:$true] %s451_s30 }
  0x6c   :  { %s703_s8 = scalar_lea.vmem %s452_s30, 128  ;;  %p708_p5 = scmp.lt.s32.totalorder %s452_s30, %s452_s30 }
  0x6d   :  { %538 = vmatpush1.bf16.msra.mxu1 %v537_v63  ;;  %v349_v63 = vld [vmem:[#allocation8 + $0xb0] sm:$0xff]  ;;  %580 = vmatprep.subr.bf16.mxu0 %v579_v60  ;;  %v437_v60 = vand.u32 127, %v91_v21  ;;  %p704_p4 = scmp.ne.s32.totalorder %s452_s30, %s703_s8  ;;  %p709_p6 = scmp.lt.s32.totalorder %s703_s8, %s703_s8 }
  0x6e   :  { %540 = vmatprep.subr.bf16.mxu1 %v539_v0  ;;  %v350_v0 = vld [vmem:[#allocation8 + $0xb8] sm:$0xff] }
  0x6f   :  { %v583_v2 = vpack.c.bf16 %v350_v0, %v349_v63  ;;  %582 = vmatpush3.bf16.msra.mxu0 %v581_v1  ;;  %vm442_vm1 = vcmp.ge.s32.totalorder %v437_v60, 8  ;;  %p710_p7 = por %p709_p6, %p708_p5 }
  0x71   :  { %542 = vmatpush1.bf16.msra.mxu1 %v541_v5  ;;  %v351_v5 = vld [vmem:[#allocation8 + $0xc0] sm:$0xff]  ;;  %584 = vmatprep.subr.bf16.mxu0 %v583_v2  ;;  %p711_p8 = pnand %p710_p7, %p704_p4 }
  0x72   :  { %544 = vmatprep.subr.bf16.mxu1 %v543_v6  ;;  %v352_v6 = vld [vmem:[#allocation8 + $0xc8] sm:$0xff] }
  0x73   :  { %v587_v8 = vpack.c.bf16 %v352_v6, %v351_v5  ;;  %586 = vmatpush3.bf16.msra.mxu0 %v585_v7 }
  0x75   :  { %546 = vmatpush1.bf16.msra.mxu1 %v545_v11  ;;  %v353_v11 = vld [vmem:[#allocation8 + $0xd0] sm:$0xff]  ;;  %588 = vmatprep.subr.bf16.mxu0 %v587_v8 }
  0x76   :  { %548 = vmatprep.subr.bf16.mxu1 %v547_v12  ;;  %v354_v12 = vld [vmem:[#allocation8 + $0xd8] sm:$0xff] }
  0x77   :  { %v591_v14 = vpack.c.bf16 %v354_v12, %v353_v11  ;;  %590 = vmatpush3.bf16.msra.mxu0 %v589_v13 }
  0x79   :  { %550 = vmatpush1.bf16.msra.mxu1 %v549_v17  ;;  %v355_v17 = vld [vmem:[#allocation8 + $0xe0] sm:$0xff]  ;;  %592 = vmatprep.subr.bf16.mxu0 %v591_v14 }
  0x7a   :  { %552 = vmatprep.subr.bf16.mxu1 %v551_v18  ;;  %v356_v18 = vld [vmem:[#allocation8 + $0xe8] sm:$0xff] }
  0x7b   :  { %v595_v20 = vpack.c.bf16 %v356_v18, %v355_v17  ;;  %594 = vmatpush3.bf16.msra.mxu0 %v593_v19 }
  0x7d   :  { %554 = vmatpush1.bf16.msra.mxu1 %v553_v23  ;;  %596 = vmatprep.subr.bf16.mxu0 %v595_v20  ;;  %v93_v23 = vsub.s32 0, %v92_v22 }
  0x7e   :  { %556 = vmatprep.subr.bf16.mxu1 %v555_v24  ;;  %v89_v24 = vld [vmem:[%s860_s2] sm:$0x3] }
  0x7f   :  { %v94_v26 = vrot.slane %v89_v24, %v93_v23  ;;  %v98_v27 = vrot.slane %v89_v24, %v97_v25  ;;  %v247_v44 = vrot.slane %v242_v43, %v93_v23 }
  0x81   :  { %558 = vmatpush1.bf16.msra.mxu1 %v557_v29 }
  0x82   :  { %560 = vmatprep.subr.bf16.mxu1 %v559_v30 }
  0x85   :  { %562 = vmatpush1.bf16.msra.mxu1 %v561_v35  ;;  %v340_v35 = vld [vmem:[#allocation8 + $0x68] sm:$0xff] }
  0x86   :  { %564 = vmatprep.subr.bf16.mxu1 %v563_v36  ;;  %v597_v36 = vpack.c.bf16 %v340_v35, %v339_v34 }
  0x88   :  { %598 = vmatpush3.bf16.msra.mxu0 %v597_v36 }
  0x89   :  { %566 = vmatpush1.bf16.msra.mxu1 %v565_v39  ;;  %v599_v39 = vpack.c.bf16 %v358_v38, %v357_v37 }
  0x8a   :  { %568 = vmatprep.subr.bf16.mxu1 %v567_v42  ;;  %v601_v42 = vpack.c.bf16 %v342_v41, %v341_v40 }
  0x8b   :  { %600 = vmatprep.subr.bf16.mxu0 %v599_v39 }
  0x8c   :  { %602 = vmatpush3.bf16.msra.mxu0 %v601_v42 }
  0x8d   :  { %570 = vmatpush1.bf16.msra.mxu1 %v569_v45  ;;  %v251_v45 = vrot.slane %v242_v43, %v97_v25 }
 0x128   :  { %v171_v28 = vpop.f32.mrb[0].mxu0 }
 0x129   :  { %v172_v29 = vadd.f32 %v171_v28, %v94_v26  ;;  %v173_v30 = vpop.f32.mrb[1].mxu0 }
 0x12a   :  { %v174_v31 = vadd.f32 %v173_v30, %v98_v27 }
 0x12b   :  { %v176_v33 = vmax.f32 %v172_v29, 0.0 }
 0x12c   :  { %v177_v32 = vmax.f32 %v174_v31, 0.0 }
 0x12e   :  { %318 = vmatprep.mubr.f32.mxu1 %v177_v32 }
 0x12f   :  { %319 = vmatmul.mubr.f32.vlgmr.msra.gmra.mrb[0].mxu1 %v176_v33 }
 0x202   :  { %v320_v46 = vpop.f32.mrb[0].mxu1 }
 0x203   :  { %v321_v47 = vadd.f32 %v320_v46, %v247_v44  ;;  %v322_v48 = vpop.f32.mrb[1].mxu1 }
 0x204   :  { %v323_v49 = vadd.f32 %v322_v48, %v251_v45 }
 0x205   :  { %v325_v51 = vmax.f32 %v321_v47, 0.0 }
 0x206   :  { %v326_v50 = vmax.f32 %v323_v49, 0.0 }
 0x208   :  { %430 = vmatprep.mubr.f32.mxu0 %v326_v50 }
 0x209   :  { %431 = vmatmul.mubr.f32.vlgmr.msra.gmra.mrb[2].mxu0 %v325_v51 }
 0x2dc   :  { %v496_v52 = vpop.f32.mrb[2].mxu0 }
 0x2dd   :  { %v497_v54 = vpop.f32.mrb[3].mxu0 }
 0x2de   :  { %v498_v55 = vadd.f32 %v497_v54, %v496_v52 }
 0x2e0   :  { %v433_v56 = vadd.f32 %v498_v55, %v463_v53 }
 0x2e2   :  { %v438_v57 = vmax.f32 %v433_v56, -20.0 }
 0x2e4   :  { %v439_v58 = vmin.f32 %v438_v57, 2.0 }
 0x2e6   :  { %v440_v59 = vmul.f32 1.442695, %v439_v58 }
 0x2e8   :  { %613 = vpow2.f32 %v440_v59 }
 0x2f2   :  { %v614_v61 = vpop.eup %613 }
 0x2f3   :  { %v443_v62 = vsel %vm442_vm1, %v614_v61, %v433_v56 }
 0x2f4   :  { %444 = vst [vmem:[#allocation10] sm:$0xff] %v443_v62 }
 0x2f5   :  { %714 = shalt.err (!%p711_p8)
}
 0x2f6   :  { %s715_s10 = scalar_lea.hbm %s865_s7, 128 }
 0x2f7   :  { %p716_p9 = scmp.ne.s32.totalorder %s865_s7, %s715_s10  ;;  %p719_p10 = scmp.lt.u32.totalorder %s715_s10, %s865_s7 }
 0x2f9   :  { %p721_p11 = pnand %p719_p10, %p716_p9 }
 0x2fb   :  { %724 = shalt.err (!%p721_p11)
}
 0x2fc   :  { %454 = dma.vmem_to_hbm [thread:$0]  %s452_s30, 128, %s865_s7, [#allocation4]  }
 0x2fd   :  { %731 = dma.done.wait [#allocation4], 128  }
 0x2fe   :  { %732 = vsyncadd [#allocation4], 4294967168 }
 0x2ff   :  { %458 = vsyncpa [#allocation3], 1 }
 0x300   :  { %459 = vsyncpa [#allocation6], 1 }
 0x301   :  { %460 = vsyncpa [#allocation9], 1 }
 0x302   :  { %461 = vsyncpa [#allocation4], 1 }

</bundles_post_ra>
